<compile_context>
chip_gen: v5e
topology: v5e:2x2
jax: 0.10.0
libtpu: 0.0.40
codegen_flags: <defaults>
</compile_context>

<pallas_src>
import jax
import jax.numpy as jnp
from jax.experimental import pallas as pl
from jax.experimental.pallas import tpu as pltpu


def _round_up(x: int, m: int) -> int:
    return ((x + m - 1) // m) * m


def _linreg_kernel(x_ref, w_ref, b_ref, o_ref, acc_ref):
    """One (row-tile, K-tile) grid step of y = X @ w + b.

    x_ref:   (TN, TK) f32 streamed X tile
    w_ref:   (1, TK)  f32 weight row tile (VMEM-resident when kt == 1)
    b_ref:   (1,)     f32 bias scalar in SMEM
    o_ref:   (TN, 1)  f32 output rows (written on the last K step only)
    acc_ref: (TN, 1)  f32 VMEM accumulator, persists across the K axis
    """
    k = pl.program_id(1)

    @pl.when(k == 0)
    def _():
        acc_ref[...] = jnp.zeros_like(acc_ref)

    # VPU multiply + cross-lane (XLU) reduce; avoids a width-1 MXU matmul.
    acc_ref[...] += jnp.sum(x_ref[...] * w_ref[...], axis=-1, keepdims=True)

    @pl.when(k == pl.num_programs(1) - 1)
    def _():
        o_ref[...] = (acc_ref[...] + b_ref[0]).astype(o_ref.dtype)


def _vmem_budget() -> tuple[int, int]:
    """Generation-aware (per_x_buffer_bytes, vmem_limit_bytes)."""
    cap = None
    try:
        cap = pltpu.get_tpu_info().vmem_capacity_bytes
    except Exception:  # pragma: no cover - conservative fallback off-TPU / API drift
        cap = None
    if cap is not None and cap >= 100 * 1024 * 1024:
        # v5e / v6e: 128 MiB physical VMEM -> bigger tiles amortize per-step cost.
        return 16 * 1024 * 1024, 64 * 1024 * 1024
    # v7x (64 MiB physical per TC) or unknown: leave headroom for double-buffers.
    return 12 * 1024 * 1024, 40 * 1024 * 1024


def _plan_tiles(n: int, d: int, per_buffer_bytes: int) -> tuple[int, int, int]:
    """Pick (tn, tk, d_pad).

    tn: rows per block (multiple of 8); tk: features per block; d_pad: padded
    feature count (= kt * tk). d_pad != d only when the K axis is tiled.
    """
    # Keep >= 2 row steps whenever N allows it so v7x's 2 TensorCores both stream.
    tn_cap = max(8, _round_up(pl.cdiv(n, 2), 8))
    tn_cap = min(tn_cap, 2048)

    rows_fit = per_buffer_bytes // (d * 4)  # full-D f32 rows per pipeline buffer
    if rows_fit >= min(tn_cap, 128):
        # Single K tile: full-D block is a contiguous HBM slab, no copy/padding.
        tn = max(8, min(tn_cap, (rows_fit // 8) * 8))
        return tn, d, d

    # Huge D: tile the feature axis (tk multiple of 128) so VMEM never OOMs and
    # row tiles stay reasonably large.
    tn = max(8, min(tn_cap, 256))
    tk = ((per_buffer_bytes // (tn * 4)) // 128) * 128
    if tk < 128:
        tk = 128
        tn = max(8, min(tn_cap, ((per_buffer_bytes // (128 * 4)) // 8) * 8))
    tk = min(tk, _round_up(d, 128))
    kt = pl.cdiv(d, tk)
    if kt == 1:
        # Fits one K tile after all; keep full D and skip the padding copy.
        return tn, d, d
    return tn, tk, kt * tk


def linear_regression_forward(
    X: jax.Array,
    w: jax.Array,
    b: jax.Array,
    *,
    min_kernel_elements: int = 1 << 20,
    per_buffer_bytes: int | None = None,
    vmem_limit_bytes: int | None = None,
) -> jax.Array:
    """Computes X @ w + b.

    X: (N, D) float32, w: (D, 1) float32, b: (1,) float32 -> (N, 1) float32.
    """
    N, D = X.shape
    X = X.astype(jnp.float32)
    w_col = w.reshape(D, 1).astype(jnp.float32)
    b1 = jnp.asarray(b, jnp.float32).reshape(1)

    # Small-problem fast path: pallas_call fixed overhead dwarfs ~KBs of data.
    if N * D < min_kernel_elements:
        return X @ w_col + b1

    default_buf, default_limit = _vmem_budget()
    if per_buffer_bytes is None:
        per_buffer_bytes = default_buf
    if vmem_limit_bytes is None:
        vmem_limit_bytes = default_limit

    tn, tk, d_pad = _plan_tiles(N, D, per_buffer_bytes)

    w_row = w_col.reshape(1, D)
    if d_pad != D:
        # K-tiled huge-D case only: zero-pad the feature axis so every (tn, tk)
        # block is in-bounds; padded lanes multiply zero weights and add 0.
        X = jnp.pad(X, ((0, 0), (0, d_pad - D)))
        w_row = jnp.pad(w_row, ((0, 0), (0, d_pad - D)))

    grid = (pl.cdiv(N, tn), d_pad // tk)

    grid_spec = pltpu.PrefetchScalarGridSpec(
        num_scalar_prefetch=0,
        grid=grid,
        in_specs=[
            # X row/feature tiles, double-buffered by the pipeline.
            pl.BlockSpec((tn, tk), lambda i, k: (i, k)),
            # Weight row tile (constant over i; VMEM-resident when kt == 1).
            pl.BlockSpec((1, tk), lambda i, k: (0, k)),
            # Bias scalar lives in SMEM (no per-step VMEM DMA / wasted vreg).
            pl.BlockSpec(memory_space=pltpu.MemorySpace.SMEM),
        ],
        out_specs=pl.BlockSpec((tn, 1), lambda i, k: (i, 0)),
        scratch_shapes=[pltpu.VMEM((tn, 1), jnp.float32)],
    )

    out = pl.pallas_call(
        _linreg_kernel,
        out_shape=jax.ShapeDtypeStruct((N, 1), jnp.float32),
        grid_spec=grid_spec,
        compiler_params=pltpu.CompilerParams(
            # Row tiles shard over v7x's 2 TCs; K is a reduction -> arbitrary.
            dimension_semantics=("parallel", "arbitrary"),
            vmem_limit_bytes=vmem_limit_bytes,
        ),
    )(X, w_row, b1)

    return out


if __name__ == "__main__":
    # Shapes implied by the module: X (batch, features_dim), w (features_dim, 1), b (1,)
    batch = 8
    features_dim = 32

    key = jax.random.PRNGKey(0)
    kx, kw, kstd, kx2, kx3 = jax.random.split(key, 5)

    # Deterministic parameter init mimicking torch.normal(0, random.random(), (D, 1))
    std = float(jax.random.uniform(kstd, (), minval=0.0, maxval=1.0))
    w = std * jax.random.normal(kw, (features_dim, 1), dtype=jnp.float32)
    b = jnp.zeros((1,), dtype=jnp.float32)
    X = jax.random.normal(kx, (batch, features_dim), dtype=jnp.float32)

    highest = jax.lax.Precision.HIGHEST

    # 1) Module-sized problem: takes the small-problem jnp fast path.
    out = jax.block_until_ready(linear_regression_forward(X, w, b))
    ref = jnp.matmul(X, w, precision=highest) + b
    assert out.shape == (batch, 1)
    assert jnp.allclose(out, ref, atol=1e-5, rtol=1e-5)

    # 2) Pallas kernel path (forced): ragged N (masked last row block), single K tile.
    N2, D2 = 300, 256
    w2 = std * jax.random.normal(kw, (D2, 1), dtype=jnp.float32)
    X2 = jax.random.normal(kx2, (N2, D2), dtype=jnp.float32)
    out2 = jax.block_until_ready(
        linear_regression_forward(X2, w2, b, min_kernel_elements=0))
    ref2 = jnp.matmul(X2, w2, precision=highest) + b
    assert out2.shape == (N2, 1)
    assert jnp.allclose(out2, ref2, atol=1e-4, rtol=1e-4)

    # 3) Pallas kernel path (forced): tiny per-buffer budget to exercise the
    #    K-tiled accumulator (tk=128, kt=3) and the feature-axis padding (320->384).
    N3, D3 = 72, 320
    w3 = std * jax.random.normal(kw, (D3, 1), dtype=jnp.float32)
    X3 = jax.random.normal(kx3, (N3, D3), dtype=jnp.float32)
    out3 = jax.block_until_ready(
        linear_regression_forward(X3, w3, b, min_kernel_elements=0,
                                  per_buffer_bytes=32 * 1024))
    ref3 = jnp.matmul(X3, w3, precision=highest) + b
    assert out3.shape == (N3, 1)
    assert jnp.allclose(out3, ref3, atol=1e-4, rtol=1e-4)

    print("KERNEL_OK")
</pallas_src>

<mosaic_0001>
module attributes {stable_mosaic.version = 11 : i64} {
  func.func @_linreg_kernel(%arg0: i32, %arg1: i32, %arg2: memref<152x256xf32, #tpu.memory_space<vmem>>, %arg3: memref<1x256xf32, #tpu.memory_space<vmem>>, %arg4: memref<1xf32, #tpu.memory_space<smem>>, %arg5: memref<152x1xf32, #tpu.memory_space<vmem>>, %arg6: memref<152x1xf32, #tpu.memory_space<vmem>>) attributes {dimension_semantics = [#tpu.dimension_semantics<parallel>, #tpu.dimension_semantics<arbitrary>], iteration_bounds = array<i64: 2, 1>, scalar_prefetch = 0 : i64, scratch_operands = 1 : i64, tpu.core_type = #tpu.core_type<tc>, window_params = [{transform_indices = @transform_0, window_bounds = array<i64: 152, 256>}, {transform_indices = @transform_1, window_bounds = array<i64: 1, 256>}, {transform_indices = @transform_2, window_bounds = array<i64: 1>}, {transform_indices = @transform_3, window_bounds = array<i64: 152, 1>}]} {
    %c0_i32 = arith.constant 0 : i32
    %0 = arith.cmpi eq, %arg1, %c0_i32 : i32
    %1 = arith.extui %0 : i1 to i32
    %c0_i32_0 = arith.constant 0 : i32
    %2 = arith.cmpi ne, %1, %c0_i32_0 : i32
    scf.if %2 {
      %cst_10 = arith.constant 0.000000e+00 : f32
      %15 = vector.broadcast %cst_10 : f32 to vector<152x1xf32>
      %c0_11 = arith.constant 0 : index
      %c0_12 = arith.constant 0 : index
      %16 = vector.load %arg6[%c0_11, %c0_12] : memref<152x1xf32, #tpu.memory_space<vmem>>, vector<152x1xf32>
      tpu.vector_store %arg6[%c0_11, %c0_12], %15 {strides = array<i32>} : memref<152x1xf32, #tpu.memory_space<vmem>>, vector<152x1xf32>,
    } else {
    }
    %c0 = arith.constant 0 : index
    %c0_1 = arith.constant 0 : index
    %3 = vector.load %arg6[%c0, %c0_1] : memref<152x1xf32, #tpu.memory_space<vmem>>, vector<152x1xf32>
    %c0_2 = arith.constant 0 : index
    %c0_3 = arith.constant 0 : index
    %4 = vector.load %arg2[%c0_2, %c0_3] : memref<152x256xf32, #tpu.memory_space<vmem>>, vector<152x256xf32>
    %c0_4 = arith.constant 0 : index
    %c0_5 = arith.constant 0 : index
    %5 = vector.load %arg3[%c0_4, %c0_5] : memref<1x256xf32, #tpu.memory_space<vmem>>, vector<1x256xf32>
    %6 = vector.broadcast %5 : vector<1x256xf32> to vector<152x256xf32>
    %7 = arith.mulf %4, %6 : vector<152x256xf32>
    %cst = arith.constant dense<0.000000e+00> : vector<152xf32>
    %8 = vector.multi_reduction <add>, %7, %cst [1] : vector<152x256xf32> to vector<152xf32>
    %9 = vector.shape_cast %8 : vector<152xf32> to vector<152x1xf32>
    %10 = arith.addf %3, %9 : vector<152x1xf32>
    %c0_6 = arith.constant 0 : index
    %c0_7 = arith.constant 0 : index
    %11 = vector.load %arg6[%c0_6, %c0_7] : memref<152x1xf32, #tpu.memory_space<vmem>>, vector<152x1xf32>
    tpu.vector_store %arg6[%c0_6, %c0_7], %10 {strides = array<i32>} : memref<152x1xf32, #tpu.memory_space<vmem>>, vector<152x1xf32>,
    %c0_i32_8 = arith.constant 0 : i32
    %12 = arith.cmpi eq, %arg1, %c0_i32_8 : i32
    %13 = arith.extui %12 : i1 to i32
    %c0_i32_9 = arith.constant 0 : i32
    %14 = arith.cmpi ne, %13, %c0_i32_9 : i32
    scf.if %14 {
      %c0_10 = arith.constant 0 : index
      %c0_11 = arith.constant 0 : index
      %15 = vector.load %arg6[%c0_10, %c0_11] : memref<152x1xf32, #tpu.memory_space<vmem>>, vector<152x1xf32>
      %c0_12 = arith.constant 0 : index
      %16 = memref.load %arg4[%c0_12] : memref<1xf32, #tpu.memory_space<smem>>
      %17 = vector.broadcast %16 : f32 to vector<152x1xf32>
      %18 = arith.addf %15, %17 : vector<152x1xf32>
      %c0_13 = arith.constant 0 : index
      %c0_14 = arith.constant 0 : index
      %19 = vector.load %arg5[%c0_13, %c0_14] : memref<152x1xf32, #tpu.memory_space<vmem>>, vector<152x1xf32>
      tpu.vector_store %arg5[%c0_13, %c0_14], %18 {strides = array<i32>} : memref<152x1xf32, #tpu.memory_space<vmem>>, vector<152x1xf32>,
    } else {
    }
    return
  }
  func.func @transform_0(%arg0: i32, %arg1: i32) -> (i32, i32) {
    %c0_i32 = arith.constant 0 : i32
    return %arg0, %arg1 : i32, i32
  }
  func.func @transform_1(%arg0: i32, %arg1: i32) -> (i32, i32) {
    %c0_i32 = arith.constant 0 : i32
    %c0_i32_0 = arith.constant 0 : i32
    return %c0_i32, %arg1 : i32, i32
  }
  func.func @transform_2(%arg0: i32, %arg1: i32) -> i32 {
    %c0_i32 = arith.constant 0 : i32
    %c0_i32_0 = arith.constant 0 : i32
    return %c0_i32 : i32
  }
  func.func @transform_3(%arg0: i32, %arg1: i32) -> (i32, i32) {
    %c0_i32 = arith.constant 0 : i32
    %c0_i32_0 = arith.constant 0 : i32
    return %arg0, %c0_i32 : i32, i32
  }
}

</mosaic_0001>

<bundles_post_ra>
// kernel: tpu_custom_call.1
= control target key start
LH: loop header
LB: loop body
LE: loop exit
PB: predicated region body
PF: predicated region fallthrough
CT: control target
= control target key end

     0   :  { %s1054_s0 = inlined_call_operand.hbm [shape: f32[300,256], index: 0, kind: input, shape index: {}]   ;;  %s1055_s1 = inlined_call_operand.vmem [shape: f32[1,256], index: 1, kind: input, shape index: {}]   ;;  %s1056_s2 = inlined_call_operand.<no memory space> [shape: f32[1], index: 2, kind: input, shape index: {}]   ;;  %s1057_s3 = inlined_call_operand.vmem [shape: f32[300,1], index: 3, kind: output, shape index: {}]  }
   0x1   :  { %8 = sst [smem:[#allocation3]] %s1056_s2 }
   0x2   :  { %9 = vsyncpa [#allocation5], 0 }
   0x3   :  { %11 = vsyncpa [#allocation5 + $0x1], 0  ;;  %s789_s14 = smov 0   ;;  %s791_s15 = smov 0  }
   0x4   :  { %s793_s16 = smov 0   ;;  %s795_s17 = smov 0  }
   0x5   :  { %s797_s18 = smov 0   ;;  %s799_s19 = smov 0  }
   0x6 LB: > { %s607_s2 = sadd.s32 4294967295, %s761_s19   ;;  %s29_s20 = sadd.s32 1, %s757_s18  ;;  %s761_s19 = sphi %s799_s19, %s17_s19   ;;  %s757_s18 = sphi %s797_s18, %s1063_s18   ;;  %s753_s17 = sphi %s795_s17, %s1062_s17   ;;  %s749_s16 = sphi %s793_s16, %s1061_s16   ;;  %s745_s15 = sphi %s791_s15, %s1060_s15   ;;  %s741_s14 = sphi %s789_s14, %s1059_s14  }
   0x7   : > { %p31_p0 = scmp.ge.s32.totalorder %s29_s20, 2  ;;  %s38_s21 = sadd.s32 1, %s749_s16 }
   0x8   : > { %p45_p1 = scmp.ne.s32.totalorder %s749_s16, %s745_s15  ;;  %p46_p2 = scmp.eq.s32.totalorder %s761_s19, 0 }
   0x9   : > { %s1065_s20 = smov (%p31_p0, %s29_s20), 0  ;;  %p51_p4 = scmp.ne.s32.totalorder %s745_s15, %s741_s14 }
   0xa   : > { %p47_p3 = por %p46_p2, %p45_p1  ;;  %s33_s22 = ssub.s32 %s757_s18, %s1065_s20 }
   0xb   : > { %p52_p5 = scmp.eq.s32.totalorder %s607_s2, 0  ;;  %p36_p6 = scmp.eq.s32.totalorder %s33_s22, 0 }
   0xc   : > { %p629_p8 = scmp.lt.s32.totalorder %s761_s19, 2  ;;  %s159_s25 = sand.u32 1, %s749_s16  }
   0xd   : > { %p828_p7 = por %p52_p5, %p51_p4  ;;  %s620_s26 = smul.u32 304, %s757_s18 }
   0xe   : > { %s834_s24 = scalar_select %p36_p6, %s749_s16, %s38_s21  }
   0xf   : > { %s621_s27 = smul.u32 304, %s159_s25  ;;  %s171_s30 = scalar_lea.hbm %s1054_s0, %s620_s26 }
  0x10   : > { %p626_p9 = pnand %p629_p8, %p47_p3  ;;  %s172_s4 = sshll.u32 %s171_s30, 4  ;;  %s173_s4 = int_to_ptr.hbm [resolvable:$true] %s172_s4 }
  0x11   : > { %s163_s5 = scalar_lea.vmem [#allocation4], %s621_s27  ;;  %s160_s7 = scalar_lea.sflag [#allocation5], %s159_s25 }
  0x12   : > { %s174_s6 = sshll.u32 %s163_s5, 4  ;;  %s763_s8 = smov 256   ;;  %s175_s6 = int_to_ptr.vmem [resolvable:$true] %s174_s6 }
  0x13   : > { %s764_s9 = smov 16   ;;  %p614_p10 = scmp.ge.s32.totalorder %s761_s19, 1 }
  0x14   : > { %628 = dma.hbm_to_vmem [thread:$0]  (!%p626_p9), %s173_s4, 4864, %s175_s6, %s160_s7, %s763_s8, %s763_s8, %s764_s9  }
  0x15   : > { %p182_p11 = scmp.lt.s32.totalorder %s761_s19, 3 }
  0x17   : > { %p183_p12 = pnand %p614_p10, %p182_p11 }
  0x18   : > { %s188_s10 = sand.u32 (!%p183_p12), 1, %s745_s15  }
  0x19   : > { %186 = sbr.rel (%p183_p12) target bundleno = 216 (0xd8), region = 32  ;;  %s189_s12 = scalar_lea.sflag (!%p183_p12), [#allocation5], %s188_s10 }
  0x1a   : > { %s622_s11 = smul.u32 (!%p183_p12), 304, %s188_s10 }
  0x1c   : > { %s844_s13 = scalar_lea.vmem (!%p183_p12), [#allocation4], %s622_s11 }
  0x1e   : > { %736 = dma.done.wait (%p828_p7), %s189_s12, 4864  }
  0x1f   : > { %738 = vsyncadd (%p828_p7), %s189_s12, 4294962432  ;;  %v276_v0 = vld [vmem:[%s844_s13] sm:$0xff]  ;;  %v277_v1 = vld [vmem:[%s844_s13 + $0x8] sm:$0xff]  ;;  %vm237_vm0 = vcmask 7168   ;;  %v765_v60 = vmov 0.0   ;;  %s227_s21 = smul.u32 19, %s753_s17 }
  0x20   : > { %v314_v2 = vld [vmem:[%s1055_s1] sm:$0x3]  ;;  %v284_v5 = vld [vmem:[%s844_s13 + $0x40] sm:$0xff]  ;;  %v278_v13 = vld [vmem:[%s844_s13 + $0x10] sm:$0xff]  ;;  %238 = vst.msk [vmem:[#allocation2] sm:$0xff] %vm237_vm0, %v765_v60  ;;  %s476_s22 = sld [smem:[#allocation3]] }
  0x21   : > { %v855_v3 = vperm.slane %v314_v2, 0  ;;  %v857_v4 = vperm.slane %v314_v2, 1  ;;  %v285_v6 = vld [vmem:[%s844_s13 + $0x48] sm:$0xff]  ;;  %v280_v7 = vld [vmem:[%s844_s13 + $0x20] sm:$0xff]  ;;  %v279_v16 = vld [vmem:[%s844_s13 + $0x18] sm:$0xff]  ;;  %239 = vst.msk [vmem:[#allocation2 + $0x8] sm:$0xff] %vm237_vm0, %v765_v60 }
  0x22   : > { %v281_v8 = vld [vmem:[%s844_s13 + $0x28] sm:$0xff]  ;;  %v286_v17 = vld [vmem:[%s844_s13 + $0x50] sm:$0xff]  ;;  %v287_v18 = vld [vmem:[%s844_s13 + $0x58] sm:$0xff]  ;;  %240 = vst.msk [vmem:[#allocation2 + $0x10] sm:$0xff] %vm237_vm0, %v765_v60  ;;  %p228_p13 = scmp.lt.s32.totalorder %s227_s21, 37 }
  0x23   : > { %v320_v9 = vmul.f32 %v855_v3, %v276_v0  ;;  %v321_v10 = vmul.f32 %v857_v4, %v277_v1  ;;  %v328_v11 = vmul.f32 %v855_v3, %v284_v5  ;;  %v329_v12 = vmul.f32 %v857_v4, %v285_v6  ;;  %v282_v21 = vld [vmem:[%s844_s13 + $0x30] sm:$0xff]  ;;  %v283_v22 = vld [vmem:[%s844_s13 + $0x38] sm:$0xff]  ;;  %v288_v32 = vld [vmem:[%s844_s13 + $0x60] sm:$0xff]  ;;  %241 = vst.msk [vmem:[#allocation2 + $0x18] sm:$0xff] %vm237_vm0, %v765_v60 }
  0x24   : > { %v324_v14 = vmul.f32 %v855_v3, %v280_v7  ;;  %v325_v15 = vmul.f32 %v857_v4, %v281_v8  ;;  %v322_v24 = vmul.f32 %v855_v3, %v278_v13  ;;  %v323_v25 = vmul.f32 %v857_v4, %v279_v16  ;;  %v289_v34 = vld [vmem:[%s844_s13 + $0x68] sm:$0xff]  ;;  %v292_v35 = vld [vmem:[%s844_s13 + $0x80] sm:$0xff]  ;;  %v290_v37 = vld [vmem:[%s844_s13 + $0x70] sm:$0xff]  ;;  %242 = vst.msk [vmem:[#allocation2 + $0x20] sm:$0xff] %vm237_vm0, %v765_v60  ;;  %s1067_s21 = smov (!%p228_p13, %s227_s21), 37 }
  0x25   : > { %v358_v19 = vadd.f32 %v321_v10, %v320_v9  ;;  %v370_v20 = vadd.f32 %v329_v12, %v328_v11  ;;  %v330_v26 = vmul.f32 %v855_v3, %v286_v17  ;;  %v331_v27 = vmul.f32 %v857_v4, %v287_v18  ;;  %v293_v36 = vld [vmem:[%s844_s13 + $0x88] sm:$0xff]  ;;  %v291_v38 = vld [vmem:[%s844_s13 + $0x78] sm:$0xff]  ;;  %v294_v47 = vld [vmem:[%s844_s13 + $0x90] sm:$0xff]  ;;  %243 = vst.msk [vmem:[#allocation2 + $0x28] sm:$0xff] %vm237_vm0, %v765_v60  ;;  %s615_s17 = sshll.u32 %s1067_s21, 3 }
  0x26   : > { %v364_v23 = vadd.f32 %v325_v15, %v324_v14  ;;  %v326_v28 = vmul.f32 %v855_v3, %v282_v21  ;;  %v327_v29 = vmul.f32 %v857_v4, %v283_v22  ;;  %v361_v30 = vadd.f32 %v323_v25, %v322_v24  ;;  %v295_v48 = vld [vmem:[%s844_s13 + $0x98] sm:$0xff]  ;;  %v298_v50 = vld [vmem:[%s844_s13 + $0xb0] sm:$0xff]  ;;  %v296_v52 = vld [vmem:[%s844_s13 + $0xa0] sm:$0xff]  ;;  %244 = vst.msk [vmem:[#allocation2 + $0x30] sm:$0xff] %vm237_vm0, %v765_v60  ;;  %s961_s26 = scalar_lea.vmem %s1057_s3, %s615_s17 }
  0x27   : > { %359 = vadd.xlane.f32.xlu0 %v358_v19  ;;  %371 = vadd.xlane.f32.xlu2 %v370_v20  ;;  %v373_v31 = vadd.f32 %v331_v27, %v330_v26  ;;  %v332_v39 = vmul.f32 %v855_v3, %v288_v32  ;;  %v333_v40 = vmul.f32 %v857_v4, %v289_v34  ;;  %v299_v51 = vld [vmem:[%s844_s13 + $0xb8] sm:$0xff]  ;;  %v297_v53 = vld [vmem:[%s844_s13 + $0xa8] sm:$0xff]  ;;  %v300_v63 = vld [vmem:[%s844_s13 + $0xc0] sm:$0xff] }
  0x28   : > { %365 = vadd.xlane.f32.xlu1 %v364_v23  ;;  %v367_v33 = vadd.f32 %v327_v29, %v326_v28  ;;  %v336_v41 = vmul.f32 %v855_v3, %v292_v35  ;;  %v337_v42 = vmul.f32 %v857_v4, %v293_v36  ;;  %v334_v43 = vmul.f32 %v855_v3, %v290_v37  ;;  %v301_v1 = vld [vmem:[%s844_s13 + $0xc8] sm:$0xff]  ;;  %v304_v2 = vld [vmem:[%s844_s13 + $0xe0] sm:$0xff]  ;;  %v302_v6 = vld [vmem:[%s844_s13 + $0xd0] sm:$0xff] }
  0x29   : > { %v335_v44 = vmul.f32 %v857_v4, %v291_v38  ;;  %v376_v45 = vadd.f32 %v333_v40, %v332_v39  ;;  %v338_v54 = vmul.f32 %v855_v3, %v294_v47  ;;  %v339_v55 = vmul.f32 %v857_v4, %v295_v48  ;;  %v305_v5 = vld [vmem:[%s844_s13 + $0xe8] sm:$0xff]  ;;  %v303_v7 = vld [vmem:[%s844_s13 + $0xd8] sm:$0xff]  ;;  %245 = vst.msk [vmem:[#allocation2 + $0x38] sm:$0xff] %vm237_vm0, %v765_v60  ;;  %v306_v16 = vld [vmem:[%s844_s13 + $0xf0] sm:$0xff] }
  0x2a   : > { %v382_v46 = vadd.f32 %v337_v42, %v336_v41  ;;  %v342_v56 = vmul.f32 %v855_v3, %v298_v50  ;;  %v343_v57 = vmul.f32 %v857_v4, %v299_v51  ;;  %v340_v58 = vmul.f32 %v855_v3, %v296_v52  ;;  %246 = vst.msk [vmem:[#allocation2 + $0x40] sm:$0xff] %vm237_vm0, %v765_v60  ;;  %v307_v18 = vld [vmem:[%s844_s13 + $0xf8] sm:$0xff]  ;;  %v310_v19 = vld [vmem:[%s844_s13 + $0x110] sm:$0xff]  ;;  %v308_v21 = vld [vmem:[%s844_s13 + $0x100] sm:$0xff] }
  0x2b   : > { %v379_v49 = vadd.f32 %v335_v44, %v334_v43  ;;  %v341_v59 = vmul.f32 %v857_v4, %v297_v53  ;;  %v385_v61 = vadd.f32 %v339_v55, %v338_v54  ;;  %v344_v8 = vmul.f32 %v855_v3, %v300_v63  ;;  %247 = vst.msk [vmem:[#allocation2 + $0x48] sm:$0xff] %vm237_vm0, %v765_v60  ;;  %v311_v20 = vld [vmem:[%s844_s13 + $0x118] sm:$0xff]  ;;  %v309_v22 = vld [vmem:[%s844_s13 + $0x108] sm:$0xff]  ;;  %v312_v32 = vld [vmem:[%s844_s13 + $0x120] sm:$0xff] }
  0x2c   : > { %v391_v62 = vadd.f32 %v343_v57, %v342_v56  ;;  %v345_v9 = vmul.f32 %v857_v4, %v301_v1  ;;  %v348_v10 = vmul.f32 %v855_v3, %v304_v2  ;;  %v349_v11 = vmul.f32 %v857_v4, %v305_v5  ;;  %248 = vst.msk [vmem:[#allocation2 + $0x50] sm:$0xff] %vm237_vm0, %v765_v60  ;;  %v257_v37 = vld [vmem:[#allocation2] sm:$0xff]  ;;  %v259_v39 = vld [vmem:[#allocation2 + $0x10] sm:$0xff]  ;;  %v260_v52 = vld [vmem:[#allocation2 + $0x18] sm:$0xff] }
  0x2d   : > { %v388_v0 = vadd.f32 %v341_v59, %v340_v58  ;;  %v346_v12 = vmul.f32 %v855_v3, %v302_v6  ;;  %v347_v13 = vmul.f32 %v857_v4, %v303_v7  ;;  %249 = vst.msk [vmem:[#allocation2 + $0x58] sm:$0xff] %vm237_vm0, %v765_v60  ;;  %v350_v23 = vmul.f32 %v855_v3, %v306_v16  ;;  %v261_v38 = vld [vmem:[#allocation2 + $0x20] sm:$0xff] }
  0x2e   : > { %v394_v14 = vadd.f32 %v345_v9, %v344_v8  ;;  %v400_v15 = vadd.f32 %v349_v11, %v348_v10  ;;  %250 = vst.msk [vmem:[#allocation2 + $0x60] sm:$0xff] %vm237_vm0, %v765_v60  ;;  %v351_v24 = vmul.f32 %v857_v4, %v307_v18  ;;  %v354_v25 = vmul.f32 %v855_v3, %v310_v19 }
  0x2f   : > { %362 = vadd.xlane.f32.xlu0 %v361_v30  ;;  %374 = vadd.xlane.f32.xlu2 %v373_v31  ;;  %v397_v17 = vadd.f32 %v347_v13, %v346_v12  ;;  %251 = vst.msk [vmem:[#allocation2 + $0x68] sm:$0xff] %vm237_vm0, %v765_v60  ;;  %v355_v26 = vmul.f32 %v857_v4, %v311_v20 }
  0x30   : > { %368 = vadd.xlane.f32.xlu1 %v367_v33  ;;  %252 = vst.msk [vmem:[#allocation2 + $0x70] sm:$0xff] %vm237_vm0, %v765_v60  ;;  %v352_v27 = vmul.f32 %v855_v3, %v308_v21  ;;  %v353_v28 = vmul.f32 %v857_v4, %v309_v22  ;;  %v403_v29 = vadd.f32 %v351_v24, %v350_v23  ;;  %v313_v33 = vld [vmem:[%s844_s13 + $0x128] sm:$0xff] }
  0x31   : > { %253 = vst.msk [vmem:[#allocation2 + $0x78] sm:$0xff] %vm237_vm0, %v765_v60  ;;  %v409_v30 = vadd.f32 %v355_v26, %v354_v25  ;;  %v356_v34 = vmul.f32 %v855_v3, %v312_v32  ;;  %v357_v35 = vmul.f32 %v857_v4, %v313_v33  ;;  %v258_v3 = vld [vmem:[#allocation2 + $0x8] sm:$0xff] }
  0x32   : > { %254 = vst.msk [vmem:[#allocation2 + $0x80] sm:$0xff] %vm237_vm0, %v765_v60  ;;  %v406_v31 = vadd.f32 %v353_v28, %v352_v27  ;;  %v262_v4 = vld [vmem:[#allocation2 + $0x28] sm:$0xff] }
  0x33   : > { %255 = vst.msk [vmem:[#allocation2 + $0x88] sm:$0xff] %vm237_vm0, %v765_v60  ;;  %v412_v36 = vadd.f32 %v357_v35, %v356_v34  ;;  %v266_v11 = vld [vmem:[#allocation2 + $0x48] sm:$0xff] }
  0x34   : > { %256 = vst.msk [vmem:[#allocation2 + $0x90] sm:$0xff] %vm237_vm0, %v765_v60  ;;  %v263_v60 = vld [vmem:[#allocation2 + $0x30] sm:$0xff]  ;;  %v268_v12 = vld [vmem:[#allocation2 + $0x58] sm:$0xff] }
  0x35   : > { %v269_v27 = vld [vmem:[#allocation2 + $0x60] sm:$0xff] }
  0x36   : > { %v270_v32 = vld [vmem:[#allocation2 + $0x68] sm:$0xff] }
  0x37   : > { %377 = vadd.xlane.f32.xlu0 %v376_v45  ;;  %383 = vadd.xlane.f32.xlu2 %v382_v46  ;;  %v956_v46 = vstv %s476_s22  ;;  %v271_v28 = vld [vmem:[#allocation2 + $0x70] sm:$0xff] }
  0x38   : > { %380 = vadd.xlane.f32.xlu1 %v379_v49 }
  0x3f   : > { %386 = vadd.xlane.f32.xlu0 %v385_v61  ;;  %392 = vadd.xlane.f32.xlu2 %v391_v62  ;;  %v265_v61 = vld [vmem:[#allocation2 + $0x40] sm:$0xff] }
  0x40   : > { %389 = vadd.xlane.f32.xlu1 %v388_v0  ;;  %v264_v0 = vld [vmem:[#allocation2 + $0x38] sm:$0xff] }
  0x47   : > { %395 = vadd.xlane.f32.xlu0 %v394_v14  ;;  %401 = vadd.xlane.f32.xlu2 %v400_v15 }
  0x48   : > { %398 = vadd.xlane.f32.xlu1 %v397_v17  ;;  %v267_v17 = vld [vmem:[#allocation2 + $0x50] sm:$0xff] }
  0x4f   : > { %404 = vadd.xlane.f32.xlu0 %v403_v29  ;;  %410 = vadd.xlane.f32.xlu2 %v409_v30 }
  0x50   : > { %407 = vadd.xlane.f32.xlu1 %v406_v31 }
  0x57   : > { %413 = vadd.xlane.f32.xlu0 %v412_v36 }
  0x9a   : > { %v360_v40 = vpop.xlane.xlu0 %359  ;;  %v372_v41 = vpop.xlane.xlu2 %371 }
  0x9b   : > { %v415_v42 = vadd.f32 %v360_v40, %v257_v37  ;;  %v419_v43 = vadd.f32 %v372_v41, %v261_v38  ;;  %v366_v44 = vpop.xlane.xlu1 %365 }
  0x9c   : > { %v417_v45 = vadd.f32 %v366_v44, %v259_v39 }
  0x9d   : > { %435 = vst.msk [vmem:[#allocation2] sm:$0xff] %vm237_vm0, %v415_v42  ;;  %v272_v42 = vld [vmem:[#allocation2 + $0x78] sm:$0xff] }
  0x9e   : > { %439 = vst.msk [vmem:[#allocation2 + $0x20] sm:$0xff] %vm237_vm0, %v419_v43  ;;  %v274_v43 = vld [vmem:[#allocation2 + $0x88] sm:$0xff] }
  0x9f   : > { %437 = vst.msk [vmem:[#allocation2 + $0x10] sm:$0xff] %vm237_vm0, %v417_v45 }
  0xa2   : > { %v363_v47 = vpop.xlane.xlu0 %362  ;;  %v375_v48 = vpop.xlane.xlu2 %374 }
  0xa3   : > { %v416_v49 = vadd.f32 %v363_v47, %v258_v3  ;;  %v420_v50 = vadd.f32 %v375_v48, %v262_v4  ;;  %v369_v51 = vpop.xlane.xlu1 %368  ;;  %v273_v4 = vld [vmem:[#allocation2 + $0x80] sm:$0xff] }
  0xa4   : > { %v457_v53 = vld [vmem:[#allocation2] sm:$0xff]  ;;  %v418_v58 = vadd.f32 %v369_v51, %v260_v52 }
  0xa5   : > { %v478_v54 = vadd.f32 %v956_v46, %v457_v53  ;;  %v461_v55 = vld [vmem:[#allocation2 + $0x20] sm:$0xff]  ;;  %436 = vst.msk [vmem:[#allocation2 + $0x8] sm:$0xff] %vm237_vm0, %v416_v49 }
  0xa6   : > { %v482_v56 = vadd.f32 %v956_v46, %v461_v55  ;;  %v459_v57 = vld [vmem:[#allocation2 + $0x10] sm:$0xff]  ;;  %440 = vst.msk [vmem:[#allocation2 + $0x28] sm:$0xff] %vm237_vm0, %v420_v50 }
  0xa7   : > { %497 = vst.msk [vmem:[%s961_s26] sm:$0xff] %vm237_vm0, %v478_v54  ;;  %v480_v59 = vadd.f32 %v956_v46, %v459_v57 }
  0xa8   : > { %501 = vst.msk [vmem:[%s961_s26 + $0x20] sm:$0xff] %vm237_vm0, %v482_v56  ;;  %v275_v56 = vld [vmem:[#allocation2 + $0x90] sm:$0xff] }
  0xa9   : > { %499 = vst.msk [vmem:[%s961_s26 + $0x10] sm:$0xff] %vm237_vm0, %v480_v59 }
  0xaa   : > { %438 = vst.msk [vmem:[#allocation2 + $0x18] sm:$0xff] %vm237_vm0, %v418_v58  ;;  %v378_v62 = vpop.xlane.xlu0 %377  ;;  %v384_v63 = vpop.xlane.xlu2 %383 }
  0xab   : > { %v421_v1 = vadd.f32 %v378_v62, %v263_v60  ;;  %v423_v2 = vadd.f32 %v384_v63, %v265_v61  ;;  %v381_v5 = vpop.xlane.xlu1 %380 }
  0xac   : > { %v458_v6 = vld [vmem:[#allocation2 + $0x8] sm:$0xff]  ;;  %v422_v9 = vadd.f32 %v381_v5, %v264_v0 }
  0xad   : > { %v479_v7 = vadd.f32 %v956_v46, %v458_v6  ;;  %v462_v8 = vld [vmem:[#allocation2 + $0x28] sm:$0xff]  ;;  %441 = vst.msk [vmem:[#allocation2 + $0x30] sm:$0xff] %vm237_vm0, %v421_v1 }
  0xae   : > { %v483_v10 = vadd.f32 %v956_v46, %v462_v8  ;;  %443 = vst.msk [vmem:[#allocation2 + $0x40] sm:$0xff] %vm237_vm0, %v423_v2 }
  0xaf   : > { %498 = vst.msk [vmem:[%s961_s26 + $0x8] sm:$0xff] %vm237_vm0, %v479_v7 }
  0xb0   : > { %502 = vst.msk [vmem:[%s961_s26 + $0x28] sm:$0xff] %vm237_vm0, %v483_v10 }
  0xb1   : > { %v460_v13 = vld [vmem:[#allocation2 + $0x18] sm:$0xff]  ;;  %442 = vst.msk [vmem:[#allocation2 + $0x38] sm:$0xff] %vm237_vm0, %v422_v9 }
  0xb2   : > { %v481_v14 = vadd.f32 %v956_v46, %v460_v13  ;;  %v387_v15 = vpop.xlane.xlu0 %386  ;;  %v393_v16 = vpop.xlane.xlu2 %392 }
  0xb3   : > { %v424_v18 = vadd.f32 %v387_v15, %v266_v11  ;;  %v426_v19 = vadd.f32 %v393_v16, %v268_v12  ;;  %v390_v20 = vpop.xlane.xlu1 %389 }
  0xb4   : > { %500 = vst.msk [vmem:[%s961_s26 + $0x18] sm:$0xff] %vm237_vm0, %v481_v14  ;;  %v463_v21 = vld [vmem:[#allocation2 + $0x30] sm:$0xff]  ;;  %v425_v24 = vadd.f32 %v390_v20, %v267_v17 }
  0xb5   : > { %v484_v22 = vadd.f32 %v956_v46, %v463_v21  ;;  %v465_v23 = vld [vmem:[#allocation2 + $0x40] sm:$0xff]  ;;  %444 = vst.msk [vmem:[#allocation2 + $0x48] sm:$0xff] %vm237_vm0, %v424_v18 }
  0xb6   : > { %v486_v25 = vadd.f32 %v956_v46, %v465_v23  ;;  %446 = vst.msk [vmem:[#allocation2 + $0x58] sm:$0xff] %vm237_vm0, %v426_v19 }
  0xb7   : > { %503 = vst.msk [vmem:[%s961_s26 + $0x30] sm:$0xff] %vm237_vm0, %v484_v22 }
  0xb8   : > { %505 = vst.msk [vmem:[%s961_s26 + $0x40] sm:$0xff] %vm237_vm0, %v486_v25  ;;  %v464_v26 = vld [vmem:[#allocation2 + $0x38] sm:$0xff] }
  0xb9   : > { %v485_v29 = vadd.f32 %v956_v46, %v464_v26  ;;  %445 = vst.msk [vmem:[#allocation2 + $0x50] sm:$0xff] %vm237_vm0, %v425_v24 }
  0xba   : > { %v396_v30 = vpop.xlane.xlu0 %395  ;;  %v402_v31 = vpop.xlane.xlu2 %401 }
  0xbb   : > { %504 = vst.msk [vmem:[%s961_s26 + $0x38] sm:$0xff] %vm237_vm0, %v485_v29  ;;  %v427_v33 = vadd.f32 %v396_v30, %v269_v27  ;;  %v429_v34 = vadd.f32 %v402_v31, %v271_v28  ;;  %v399_v35 = vpop.xlane.xlu1 %398 }
  0xbc   : > { %v466_v36 = vld [vmem:[#allocation2 + $0x48] sm:$0xff]  ;;  %v428_v39 = vadd.f32 %v399_v35, %v270_v32 }
  0xbd   : > { %v487_v37 = vadd.f32 %v956_v46, %v466_v36  ;;  %v468_v38 = vld [vmem:[#allocation2 + $0x58] sm:$0xff]  ;;  %447 = vst.msk [vmem:[#allocation2 + $0x60] sm:$0xff] %vm237_vm0, %v427_v33 }
  0xbe   : > { %v489_v40 = vadd.f32 %v956_v46, %v468_v38  ;;  %449 = vst.msk [vmem:[#allocation2 + $0x70] sm:$0xff] %vm237_vm0, %v429_v34 }
  0xbf   : > { %506 = vst.msk [vmem:[%s961_s26 + $0x48] sm:$0xff] %vm237_vm0, %v487_v37 }
  0xc0   : > { %508 = vst.msk [vmem:[%s961_s26 + $0x58] sm:$0xff] %vm237_vm0, %v489_v40  ;;  %v467_v41 = vld [vmem:[#allocation2 + $0x50] sm:$0xff] }
  0xc1   : > { %v488_v44 = vadd.f32 %v956_v46, %v467_v41  ;;  %448 = vst.msk [vmem:[#allocation2 + $0x68] sm:$0xff] %vm237_vm0, %v428_v39 }
  0xc2   : > { %v405_v45 = vpop.xlane.xlu0 %404  ;;  %v411_v3 = vpop.xlane.xlu2 %410 }
  0xc3   : > { %507 = vst.msk [vmem:[%s961_s26 + $0x50] sm:$0xff] %vm237_vm0, %v488_v44  ;;  %v430_v47 = vadd.f32 %v405_v45, %v272_v42  ;;  %v432_v48 = vadd.f32 %v411_v3, %v274_v43  ;;  %v408_v49 = vpop.xlane.xlu1 %407 }
  0xc4   : > { %v469_v50 = vld [vmem:[#allocation2 + $0x60] sm:$0xff]  ;;  %v431_v53 = vadd.f32 %v408_v49, %v273_v4 }
  0xc5   : > { %v490_v51 = vadd.f32 %v956_v46, %v469_v50  ;;  %v471_v52 = vld [vmem:[#allocation2 + $0x70] sm:$0xff]  ;;  %450 = vst.msk [vmem:[#allocation2 + $0x78] sm:$0xff] %vm237_vm0, %v430_v47 }
  0xc6   : > { %v492_v54 = vadd.f32 %v956_v46, %v471_v52  ;;  %452 = vst.msk [vmem:[#allocation2 + $0x88] sm:$0xff] %vm237_vm0, %v432_v48 }
  0xc7   : > { %509 = vst.msk [vmem:[%s961_s26 + $0x60] sm:$0xff] %vm237_vm0, %v490_v51 }
  0xc8   : > { %511 = vst.msk [vmem:[%s961_s26 + $0x70] sm:$0xff] %vm237_vm0, %v492_v54  ;;  %v470_v55 = vld [vmem:[#allocation2 + $0x68] sm:$0xff] }
  0xc9   : > { %v491_v57 = vadd.f32 %v956_v46, %v470_v55  ;;  %451 = vst.msk [vmem:[#allocation2 + $0x80] sm:$0xff] %vm237_vm0, %v431_v53 }
  0xca   : > { %v414_v58 = vpop.xlane.xlu0 %413 }
  0xcb   : > { %510 = vst.msk [vmem:[%s961_s26 + $0x68] sm:$0xff] %vm237_vm0, %v491_v57  ;;  %v433_v59 = vadd.f32 %v414_v58, %v275_v56 }
  0xcc   : > { %v472_v60 = vld [vmem:[#allocation2 + $0x78] sm:$0xff] }
  0xcd   : > { %v493_v61 = vadd.f32 %v956_v46, %v472_v60  ;;  %v474_v62 = vld [vmem:[#allocation2 + $0x88] sm:$0xff]  ;;  %453 = vst.msk [vmem:[#allocation2 + $0x90] sm:$0xff] %vm237_vm0, %v433_v59 }
  0xce   : > { %v495_v63 = vadd.f32 %v956_v46, %v474_v62 }
  0xcf   : > { %512 = vst.msk [vmem:[%s961_s26 + $0x78] sm:$0xff] %vm237_vm0, %v493_v61 }
  0xd0   : > { %514 = vst.msk [vmem:[%s961_s26 + $0x88] sm:$0xff] %vm237_vm0, %v495_v63  ;;  %v473_v0 = vld [vmem:[#allocation2 + $0x80] sm:$0xff] }
  0xd1   : > { %v494_v1 = vadd.f32 %v956_v46, %v473_v0 }
  0xd3   : > { %513 = vst.msk [vmem:[%s961_s26 + $0x80] sm:$0xff] %vm237_vm0, %v494_v1 }
  0xd4   : > { %v475_v2 = vld [vmem:[#allocation2 + $0x90] sm:$0xff] }
  0xd5   : > { %v496_v5 = vadd.f32 %v956_v46, %v475_v2 }
  0xd7   : > { %515 = vst.msk [vmem:[%s961_s26 + $0x90] sm:$0xff] %vm237_vm0, %v496_v5 }
  0xd8 PF: > { %s17_s19 = sadd.s32 1, %s761_s19   ;;  %s1059_s14 = smov %s745_s15 }
  0xd9   : > { %p14_p0 = scmp.ge.s32.totalorder %s17_s19, 4   ;;  %s1060_s15 = smov %s749_s16 }
  0xda   : > { %s1061_s16 = smov %s834_s24  ;;  %s1062_s17 = smov %s757_s18 }
  0xdb   : > { %s1063_s18 = smov %s1065_s20  ;;  %16 = sbr.rel (!%p14_p0) target bundleno = 6 (0x6), region = 83 }
  0xe0   :  { %538 = vsyncpa [#allocation5], 1 }
  0xe1   :  { %540 = vsyncpa [#allocation5 + $0x1], 1 }

</bundles_post_ra>
